<compile_context>
chip_gen: v5e
topology: v5e:2x2
jax: 0.10.0
libtpu: 0.0.40
codegen_flags: <defaults>
</compile_context>

<pallas_src>
import jax
import jax.numpy as jnp
from jax.experimental import pallas as pl
from jax.experimental.pallas import tpu as pltpu


def _round_up(x: int, m: int) -> int:
    return ((x + m - 1) // m) * m


def agent_kernel(obs_ref, w_enc_ref, b_enc_ref, w_act_ref, b_act_ref, act_ref,
                 enc_out_ref, ll_out_ref):
    # obs_ref:   [TM, D]  bf16      (streamed per grid step)
    # w_enc_ref: [D, E]   bf16      (VMEM-resident across steps)
    # b_enc_ref: [1, E]   f32       (resident)
    # w_act_ref: [E, A]   bf16      (resident)
    # b_act_ref: [1, A]   f32       (resident)
    # act_ref:   [TM, 1]  int32     (streamed)
    # enc_out:   [TM, E]  f32       (streamed)
    # ll_out:    [TM, 1]  f32       (streamed)

    # State encoder: bf16 MXU matmul, f32 accumulation, f32 bias add.
    enc = jnp.dot(obs_ref[...], w_enc_ref[...],
                  preferred_element_type=jnp.float32)
    enc = enc + b_enc_ref[...]
    enc_out_ref[...] = enc

    # Action head: relu in f32, cast to bf16 for the MXU, accumulate in f32.
    h = jnp.maximum(enc, 0.0).astype(jnp.bfloat16)
    logits = jnp.dot(h, w_act_ref[...], preferred_element_type=jnp.float32)
    logits = logits + b_act_ref[...]                          # [TM, A] f32

    # Gather the taken-action logit first (one-hot select + lane-sum), then
    # subtract logsumexp; no full [TM, A] log-prob tensor is materialized.
    actions = act_ref[...]                                    # [TM, 1] int32
    col = jax.lax.broadcasted_iota(jnp.int32, logits.shape, 1)
    sel_logit = jnp.sum(jnp.where(col == actions, logits, 0.0),
                        axis=-1, keepdims=True)               # [TM, 1]

    m = jnp.max(logits, axis=-1, keepdims=True)
    lse = m + jnp.log(jnp.sum(jnp.exp(logits - m), axis=-1, keepdims=True))
    # Note: out-of-range action indices yield sel_logit == 0 (no lane matches),
    # which differs from take_along_axis clamping; callers must pass valid ids.
    ll_out_ref[...] = sel_logit - lse                         # [TM, 1]


def agent_forward(obs, w_enc, b_enc, w_act, b_act, actions, *, block_t=128):
    """AgentInput (obs [T,D], actions [T]) -> (state_encodings [T,E], action_lls [T])."""
    T, D = obs.shape
    E = w_enc.shape[1]
    A = w_act.shape[1]

    # Tile size over the time axis: multiple of 8 (sublanes); default 128
    # matches MXU row granularity.  Re-derive per chip / VMEM for long T.
    tm = max(8, min(block_t, _round_up(T, 8)))
    t_pad = pl.cdiv(T, tm) * tm
    num_blocks = t_pad // tm

    # bf16 operands for the MXU (halves HBM/VMEM traffic); biases stay f32.
    obs_bf = obs.astype(jnp.bfloat16)
    w_enc_bf = w_enc.astype(jnp.bfloat16)
    w_act_bf = w_act.astype(jnp.bfloat16)
    b_enc_2d = b_enc.reshape(1, E).astype(jnp.float32)
    b_act_2d = b_act.reshape(1, A).astype(jnp.float32)
    act_2d = actions.reshape(T, 1).astype(jnp.int32)

    if t_pad != T:
        obs_bf = jnp.pad(obs_bf, ((0, t_pad - T), (0, 0)))
        act_2d = jnp.pad(act_2d, ((0, t_pad - T), (0, 0)))

    enc_out, ll_out = pl.pallas_call(
        agent_kernel,
        out_shape=(
            jax.ShapeDtypeStruct((t_pad, E), jnp.float32),
            jax.ShapeDtypeStruct((t_pad, 1), jnp.float32),
        ),
        grid=(num_blocks,),
        in_specs=[
            pl.BlockSpec((tm, D), lambda i: (i, 0)),   # obs: streamed over T
            pl.BlockSpec((D, E), lambda i: (0, 0)),    # w_enc: resident
            pl.BlockSpec((1, E), lambda i: (0, 0)),    # b_enc: resident
            pl.BlockSpec((E, A), lambda i: (0, 0)),    # w_act: resident
            pl.BlockSpec((1, A), lambda i: (0, 0)),    # b_act: resident
            pl.BlockSpec((tm, 1), lambda i: (i, 0)),   # actions: streamed
        ],
        out_specs=(
            pl.BlockSpec((tm, E), lambda i: (i, 0)),   # state_encodings
            pl.BlockSpec((tm, 1), lambda i: (i, 0)),   # action_lls
        ),
        compiler_params=pltpu.CompilerParams(
            dimension_semantics=("parallel",),         # independent T tiles
            vmem_limit_bytes=32 * 1024 * 1024,
        ),
    )(obs_bf, w_enc_bf, b_enc_2d, w_act_bf, b_act_2d, act_2d)

    # AgentOutput: state_encodings [T, E], action_lls [T]
    return enc_out[:T], ll_out[:T, 0]


def reference_forward(obs, w_enc, b_enc, w_act, b_act, actions):
    # Same math / same bf16-operand, f32-accumulation policy as the kernel.
    enc = jnp.dot(obs.astype(jnp.bfloat16), w_enc.astype(jnp.bfloat16),
                  preferred_element_type=jnp.float32) + b_enc
    h = jnp.maximum(enc, 0.0).astype(jnp.bfloat16)
    logits = jnp.dot(h, w_act.astype(jnp.bfloat16),
                     preferred_element_type=jnp.float32) + b_act
    logp = jax.nn.log_softmax(logits, axis=-1)
    lls = jnp.take_along_axis(
        logp, actions.reshape(-1, 1).astype(jnp.int32), axis=-1)[:, 0]
    return enc, lls


if __name__ == "__main__":
    # Shapes consistent with the Agent API, chosen lane-friendly:
    T = 512                    # n_timesteps (4 grid tiles of 128)
    D = 128                    # observation dim
    E = 128                    # state_encoding_size
    A = 128                    # number of discrete actions

    key = jax.random.PRNGKey(0)
    k_obs, k_we, k_be, k_wa, k_ba, k_act = jax.random.split(key, 6)

    obs = jax.random.normal(k_obs, (T, D), dtype=jnp.float32)
    w_enc = 0.1 * jax.random.normal(k_we, (D, E), dtype=jnp.float32)
    b_enc = 0.1 * jax.random.normal(k_be, (E,), dtype=jnp.float32)
    w_act = 0.1 * jax.random.normal(k_wa, (E, A), dtype=jnp.float32)
    b_act = 0.1 * jax.random.normal(k_ba, (A,), dtype=jnp.float32)
    actions = jax.random.randint(k_act, (T,), 0, A, dtype=jnp.int32)

    enc, lls = agent_forward(obs, w_enc, b_enc, w_act, b_act, actions)
    enc = jax.block_until_ready(enc)
    lls = jax.block_until_ready(lls)

    enc_ref, lls_ref = reference_forward(obs, w_enc, b_enc, w_act, b_act, actions)
    assert enc.shape == (T, E) and lls.shape == (T,)
    assert jnp.allclose(enc, enc_ref, atol=1e-2, rtol=1e-2)
    assert jnp.allclose(lls, lls_ref, atol=1e-2, rtol=1e-2)

    print("KERNEL_OK")
</pallas_src>

<mosaic_0001>
module attributes {stable_mosaic.version = 11 : i64} {
  func.func @agent_kernel(%arg0: i32, %arg1: memref<128x128xbf16, #tpu.memory_space<vmem>>, %arg2: memref<128x128xbf16, #tpu.memory_space<vmem>>, %arg3: memref<1x128xf32, #tpu.memory_space<vmem>>, %arg4: memref<128x128xbf16, #tpu.memory_space<vmem>>, %arg5: memref<1x128xf32, #tpu.memory_space<vmem>>, %arg6: memref<128x1xi32, #tpu.memory_space<vmem>>, %arg7: memref<128x128xf32, #tpu.memory_space<vmem>>, %arg8: memref<128x1xf32, #tpu.memory_space<vmem>>) attributes {dimension_semantics = [#tpu.dimension_semantics<parallel>], iteration_bounds = array<i64: 4>, scalar_prefetch = 0 : i64, scratch_operands = 0 : i64, tpu.core_type = #tpu.core_type<tc>, window_params = [{transform_indices = @transform_0, window_bounds = array<i64: 128, 128>}, {pipeline_mode = #tpu.pipeline_mode<synchronous>, transform_indices = @transform_1, window_bounds = array<i64: 128, 128>}, {pipeline_mode = #tpu.pipeline_mode<synchronous>, transform_indices = @transform_2, window_bounds = array<i64: 1, 128>}, {pipeline_mode = #tpu.pipeline_mode<synchronous>, transform_indices = @transform_3, window_bounds = array<i64: 128, 128>}, {pipeline_mode = #tpu.pipeline_mode<synchronous>, transform_indices = @transform_4, window_bounds = array<i64: 1, 128>}, {transform_indices = @transform_5, window_bounds = array<i64: 128, 1>}, {transform_indices = @transform_6, window_bounds = array<i64: 128, 128>}, {transform_indices = @transform_7, window_bounds = array<i64: 128, 1>}]} {
    %c0 = arith.constant 0 : index
    %c0_0 = arith.constant 0 : index
    %0 = vector.load %arg1[%c0, %c0_0] : memref<128x128xbf16, #tpu.memory_space<vmem>>, vector<128x128xbf16>
    %c0_1 = arith.constant 0 : index
    %c0_2 = arith.constant 0 : index
    %1 = vector.load %arg2[%c0_1, %c0_2] : memref<128x128xbf16, #tpu.memory_space<vmem>>, vector<128x128xbf16>
    %cst = arith.constant dense<0.000000e+00> : vector<128x128xf32>
    %2 = tpu.matmul %0, %1, %cst {dimension_numbers = #tpu.dot_dimension_numbers<[1], [0], [0], [1], [0, 0, 1, 1], [], []>} : vector<128x128xbf16>, vector<128x128xbf16>, vector<128x128xf32> -> vector<128x128xf32>
    %c0_3 = arith.constant 0 : index
    %c0_4 = arith.constant 0 : index
    %3 = vector.load %arg3[%c0_3, %c0_4] : memref<1x128xf32, #tpu.memory_space<vmem>>, vector<1x128xf32>
    %4 = vector.broadcast %3 : vector<1x128xf32> to vector<128x128xf32>
    %5 = arith.addf %2, %4 : vector<128x128xf32>
    %c0_5 = arith.constant 0 : index
    %c0_6 = arith.constant 0 : index
    %6 = vector.load %arg7[%c0_5, %c0_6] : memref<128x128xf32, #tpu.memory_space<vmem>>, vector<128x128xf32>
    tpu.vector_store %arg7[%c0_5, %c0_6], %5 {strides = array<i32>} : memref<128x128xf32, #tpu.memory_space<vmem>>, vector<128x128xf32>,
    %cst_7 = arith.constant 0.000000e+00 : f32
    %7 = vector.broadcast %cst_7 : f32 to vector<128x128xf32>
    %8 = arith.maximumf %5, %7 : vector<128x128xf32>
    %9 = arith.truncf %8 : vector<128x128xf32> to vector<128x128xbf16>
    %c0_8 = arith.constant 0 : index
    %c0_9 = arith.constant 0 : index
    %10 = vector.load %arg4[%c0_8, %c0_9] : memref<128x128xbf16, #tpu.memory_space<vmem>>, vector<128x128xbf16>
    %cst_10 = arith.constant dense<0.000000e+00> : vector<128x128xf32>
    %11 = tpu.matmul %9, %10, %cst_10 {dimension_numbers = #tpu.dot_dimension_numbers<[1], [0], [0], [1], [0, 0, 1, 1], [], []>} : vector<128x128xbf16>, vector<128x128xbf16>, vector<128x128xf32> -> vector<128x128xf32>
    %c0_11 = arith.constant 0 : index
    %c0_12 = arith.constant 0 : index
    %12 = vector.load %arg5[%c0_11, %c0_12] : memref<1x128xf32, #tpu.memory_space<vmem>>, vector<1x128xf32>
    %13 = vector.broadcast %12 : vector<1x128xf32> to vector<128x128xf32>
    %14 = arith.addf %11, %13 : vector<128x128xf32>
    %c0_13 = arith.constant 0 : index
    %c0_14 = arith.constant 0 : index
    %15 = vector.load %arg6[%c0_13, %c0_14] : memref<128x1xi32, #tpu.memory_space<vmem>>, vector<128x1xi32>
    %16 = tpu.iota {dimensions = array<i32: 1>} : vector<128x128xi32>
    %17 = vector.broadcast %15 : vector<128x1xi32> to vector<128x128xi32>
    %18 = arith.cmpi eq, %16, %17 : vector<128x128xi32>
    %cst_15 = arith.constant 0.000000e+00 : f32
    %19 = vector.broadcast %cst_15 : f32 to vector<128x128xf32>
    %20 = arith.select %18, %14, %19 : vector<128x128xi1>, vector<128x128xf32>
    %cst_16 = arith.constant dense<0.000000e+00> : vector<128xf32>
    %21 = vector.multi_reduction <add>, %20, %cst_16 [1] : vector<128x128xf32> to vector<128xf32>
    %22 = vector.shape_cast %21 : vector<128xf32> to vector<128x1xf32>
    %cst_17 = arith.constant dense<0xFF800000> : vector<128xf32>
    %23 = vector.multi_reduction <maximumf>, %14, %cst_17 [1] : vector<128x128xf32> to vector<128xf32>
    %24 = vector.shape_cast %23 : vector<128xf32> to vector<128x1xf32>
    %25 = vector.broadcast %24 : vector<128x1xf32> to vector<128x128xf32>
    %26 = arith.subf %14, %25 : vector<128x128xf32>
    %27 = math.exp %26 : vector<128x128xf32>
    %cst_18 = arith.constant dense<0.000000e+00> : vector<128xf32>
    %28 = vector.multi_reduction <add>, %27, %cst_18 [1] : vector<128x128xf32> to vector<128xf32>
    %29 = vector.shape_cast %28 : vector<128xf32> to vector<128x1xf32>
    %30 = math.log %29 : vector<128x1xf32>
    %31 = arith.addf %24, %30 : vector<128x1xf32>
    %32 = arith.subf %22, %31 : vector<128x1xf32>
    %c0_19 = arith.constant 0 : index
    %c0_20 = arith.constant 0 : index
    %33 = vector.load %arg8[%c0_19, %c0_20] : memref<128x1xf32, #tpu.memory_space<vmem>>, vector<128x1xf32>
    tpu.vector_store %arg8[%c0_19, %c0_20], %32 {strides = array<i32>} : memref<128x1xf32, #tpu.memory_space<vmem>>, vector<128x1xf32>,
    return
  }
  func.func @transform_0(%arg0: i32) -> (i32, i32) {
    %c0_i32 = arith.constant 0 : i32
    %c0_i32_0 = arith.constant 0 : i32
    return %arg0, %c0_i32 : i32, i32
  }
  func.func @transform_1(%arg0: i32) -> (i32, i32) {
    %c0_i32 = arith.constant 0 : i32
    %c0_i32_0 = arith.constant 0 : i32
    %c0_i32_1 = arith.constant 0 : i32
    return %c0_i32, %c0_i32_0 : i32, i32
  }
  func.func @transform_2(%arg0: i32) -> (i32, i32) {
    %c0_i32 = arith.constant 0 : i32
    %c0_i32_0 = arith.constant 0 : i32
    %c0_i32_1 = arith.constant 0 : i32
    return %c0_i32, %c0_i32_0 : i32, i32
  }
  func.func @transform_3(%arg0: i32) -> (i32, i32) {
    %c0_i32 = arith.constant 0 : i32
    %c0_i32_0 = arith.constant 0 : i32
    %c0_i32_1 = arith.constant 0 : i32
    return %c0_i32, %c0_i32_0 : i32, i32
  }
  func.func @transform_4(%arg0: i32) -> (i32, i32) {
    %c0_i32 = arith.constant 0 : i32
    %c0_i32_0 = arith.constant 0 : i32
    %c0_i32_1 = arith.constant 0 : i32
    return %c0_i32, %c0_i32_0 : i32, i32
  }
  func.func @transform_5(%arg0: i32) -> (i32, i32) {
    %c0_i32 = arith.constant 0 : i32
    %c0_i32_0 = arith.constant 0 : i32
    return %arg0, %c0_i32 : i32, i32
  }
  func.func @transform_6(%arg0: i32) -> (i32, i32) {
    %c0_i32 = arith.constant 0 : i32
    %c0_i32_0 = arith.constant 0 : i32
    return %arg0, %c0_i32 : i32, i32
  }
  func.func @transform_7(%arg0: i32) -> (i32, i32) {
    %c0_i32 = arith.constant 0 : i32
    %c0_i32_0 = arith.constant 0 : i32
    return %arg0, %c0_i32 : i32, i32
  }
}

</mosaic_0001>

<bundles_post_ra>
// kernel: tpu_custom_call.1
= control target key start
LH: loop header
LB: loop body
LE: loop exit
PB: predicated region body
PF: predicated region fallthrough
CT: control target
= control target key end

     0   :  { %13 = vsyncpa [#allocation3], 0  ;;  %s1964_s0 = inlined_call_operand.vmem [shape: bf16[512,128], index: 0, kind: input, shape index: {}]   ;;  %s1965_s1 = inlined_call_operand.vmem [shape: bf16[128,128], index: 1, kind: input, shape index: {}]   ;;  %s1966_s2 = inlined_call_operand.vmem [shape: f32[1,128], index: 2, kind: input, shape index: {}]   ;;  %s1967_s3 = inlined_call_operand.vmem [shape: bf16[128,128], index: 3, kind: input, shape index: {}]   ;;  %s1968_s4 = inlined_call_operand.vmem [shape: f32[1,128], index: 4, kind: input, shape index: {}]   ;;  %s1969_s5 = inlined_call_operand.vmem [shape: s32[512,1], index: 5, kind: input, shape index: {}]   ;;  %s1970_s6 = inlined_call_operand.hbm [shape: f32[512,128], index: 6, kind: output, shape index: {0}]   ;;  %s1971_s7 = inlined_call_operand.vmem [shape: f32[512,1], index: 7, kind: output, shape index: {1}]  }
   0x1   :  { %15 = vsyncpa [#allocation3 + $0x1], 0  ;;  %s1472_s24 = smov 0   ;;  %s1474_s25 = smov 0  }
   0x2   :  { %s1476_s26 = smov 0   ;;  %s1478_s27 = smov 0  }
   0x3 LB: > { %s1493_s28 = sadd.s32 4294967295, %s1427_s27   ;;  %s1101_s29 = sadd.s32 4294967294, %s1427_s27   ;;  %s1427_s27 = sphi %s1478_s27, %s1977_s27   ;;  %s1423_s26 = sphi %s1476_s26, %s1976_s26   ;;  %s1419_s25 = sphi %s1474_s25, %s1975_s25   ;;  %s1415_s24 = sphi %s1472_s24, %s1974_s24  }
   0x4   : > { %s1497_s30 = sadd.s32 1, %s1427_s27   ;;  %s164_s8 = sadd.s32 1, %s1423_s26 }
   0x5   : > { %s161_s9 = ssub.s32 %s1427_s27, %s1497_s30  ;;  %p174_p0 = scmp.ne.s32.totalorder %s1423_s26, %s1419_s25 }
   0x6   : > { %p162_p1 = scmp.eq.s32.totalorder %s161_s9, 0  ;;  %p175_p2 = scmp.eq.s32.totalorder %s1493_s28, 3 }
   0x7   : > { %p180_p3 = scmp.ne.s32.totalorder %s1419_s25, %s1415_s24  ;;  %p181_p4 = scmp.eq.s32.totalorder %s1101_s29, 3 }
   0x8   : > { %s1508_s10 = scalar_select %p162_p1, %s1423_s26, %s164_s8  }
   0x9   : > { %p1510_p5 = por %p175_p2, %p174_p0  ;;  %p1514_p6 = por %p181_p4, %p180_p3 }
   0xa   : > { %p1104_p7 = scmp.ge.s32.totalorder %s1427_s27, 1  ;;  %p255_p8 = scmp.lt.s32.totalorder %s1427_s27, 5 }
   0xc   : > { %p256_p9 = pnand %p1104_p7, %p255_p8 }
   0xd   : > { %s1106_s21 = sshll.u32 (!%p256_p9), %s1493_s28, 4  ;;  %s287_s16 = sand.u32 (!%p256_p9), 1, %s1419_s25  }
   0xe   : > { %259 = sbr.rel (%p256_p9) target bundleno = 658 (0x292), region = 44  ;;  %p298_p10 = scmp.lt.s32.totalorder (!%p256_p9), %s1106_s21, 63 }
   0xf   : > { %s1105_s17 = sshll.u32 (!%p256_p9), %s287_s16, 7  ;;  %s1237_s9 = sshll.u32 (!%p256_p9), %s1493_s28, 7 }
  0x10   : > { %s1616_s23 = scalar_lea.vmem (!%p256_p9), [#allocation2], %s1105_s17  ;;  %s978_s18 = scalar_lea.sflag (!%p256_p9), [#allocation3], %s287_s16 }
  0x11   : > { %s995_s15 = sshll.u32 (!%p256_p9), %s1616_s23, 4  ;;  %s996_s15 = int_to_ptr.vmem [resolvable:$true] %s995_s15 }
  0x13   : > { %v1228_v0 = vld [vmem:[%s1965_s1 + $0x38] sm:$0xff]  ;;  %v1227_v1 = vld [vmem:[%s1965_s1 + $0x30] sm:$0xff]  ;;  %v1226_v2 = vld [vmem:[%s1965_s1 + $0x28] sm:$0xff]  ;;  %s1979_s21 = smov (!%p298_p10, %s1106_s21), 63  ;;  %v1429_v14 = vmov 0  }
  0x14   : > { %448 = vmatpush.bf16.msra.mxu0 %v1228_v0  ;;  %1238 = vmatpush.bf16.msra.mxu2 %v1228_v0  ;;  %v1225_v3 = vld [vmem:[%s1965_s1 + $0x20] sm:$0xff]  ;;  %v1224_v4 = vld [vmem:[%s1965_s1 + $0x18] sm:$0xff]  ;;  %v1223_v5 = vld [vmem:[%s1965_s1 + $0x10] sm:$0xff]  ;;  %s1107_s14 = sshll.u32 %s1979_s21, 2  ;;  %s1109_s20 = sshll.u32 %s1979_s21, 3 }
  0x15   : > { %v1222_v6 = vld [vmem:[%s1965_s1 + $0x8] sm:$0xff]  ;;  %v1221_v7 = vld [vmem:[%s1965_s1] sm:$0xff]  ;;  %s1551_s19 = scalar_lea.vmem %s1964_s0, %s1107_s14  ;;  %s1563_s29 = scalar_lea.vmem %s1969_s5, %s1109_s20  ;;  %v1236_v12 = vld [vmem:[%s1967_s3 + $0x38] sm:$0xff]  ;;  %1296 = vset.pattern.permute.xlu0 %v1429_v14  ;;  %1297 = vset.pattern.permute.xlu1 %v1429_v14 }
  0x16   : > { %v1213_v8 = vld [vmem:[%s1551_s19] sm:$0xff]  ;;  %v1214_v10 = vld [vmem:[%s1551_s19 + $0x8] sm:$0xff]  ;;  %605 = vmatpush.bf16.msra.mxu1 %v1236_v12  ;;  %v1235_v15 = vld [vmem:[%s1967_s3 + $0x30] sm:$0xff]  ;;  %1246 = vmatpush.bf16.msra.mxu3 %v1236_v12  ;;  %s994_s14 = scalar_lea.hbm %s1970_s6, %s1237_s9 }
  0x17   : > { %v1217_v9 = vld [vmem:[%s1551_s19 + $0x20] sm:$0xff]  ;;  %v1218_v11 = vld [vmem:[%s1551_s19 + $0x28] sm:$0xff]  ;;  %1298 = vset.pattern.permute.xlu2 %v1429_v14  ;;  %v1215_v19 = vld [vmem:[%s1551_s19 + $0x10] sm:$0xff]  ;;  %s997_s17 = sshll.u32 %s994_s14, 4  ;;  %s998_s17 = int_to_ptr.hbm [resolvable:$true] %s997_s17 }
  0x18   : > { %449 = vmatpush.bf16.msra.mxu0 %v1227_v1  ;;  %1239 = vmatpush.bf16.msra.mxu2 %v1227_v1  ;;  %v654_v13 = vld [vmem:[%s1563_s29] sm:$0xff]  ;;  %v1234_v16 = vld [vmem:[%s1967_s3 + $0x28] sm:$0xff]  ;;  %v1219_v20 = vld [vmem:[%s1551_s19 + $0x30] sm:$0xff]  ;;  %s1379_s22 = sshra.s32 %s998_s17, 4  ;;  %s1380_s22 = int_to_ptr.hbm [resolvable:$true] %s1379_s22 }
  0x19   : > { %673 = vperm.xlu0 %1296, %v654_v13   ;;  %v655_v17 = vld [vmem:[%s1563_s29 + $0x8] sm:$0xff]  ;;  %v1233_v18 = vld [vmem:[%s1967_s3 + $0x20] sm:$0xff]  ;;  %v1216_v21 = vld [vmem:[%s1551_s19 + $0x18] sm:$0xff]  ;;  %p1386_p0 = scmp.lt.s32.totalorder %s1380_s22, %s1970_s6 }
  0x1a   : > { %606 = vmatpush.bf16.msra.mxu1 %v1235_v15  ;;  %1247 = vmatpush.bf16.msra.mxu3 %v1235_v15  ;;  %v1220_v22 = vld [vmem:[%s1551_s19 + $0x38] sm:$0xff]  ;;  %v656_v24 = vld [vmem:[%s1563_s29 + $0x10] sm:$0xff]  ;;  %v1230_v27 = vld [vmem:[%s1967_s3 + $0x8] sm:$0xff]  ;;  %s1385_s19 = scalar_lea.hbm %s1970_s6, 512 }
  0x1b   : > { %v1232_v23 = vld [vmem:[%s1967_s3 + $0x18] sm:$0xff]  ;;  %v660_v25 = vld [vmem:[%s1563_s29 + $0x30] sm:$0xff]  ;;  %679 = vperm.xlu1 %1297, %v656_v24   ;;  %v663_v29 = vld [vmem:[%s1563_s29 + $0x48] sm:$0xff] }
  0x1c   : > { %450 = vmatpush.bf16.msra.mxu0 %v1226_v2  ;;  %1240 = vmatpush.bf16.msra.mxu2 %v1226_v2  ;;  %v1231_v26 = vld [vmem:[%s1967_s3 + $0x10] sm:$0xff]  ;;  %v657_v28 = vld [vmem:[%s1563_s29 + $0x18] sm:$0xff]  ;;  %v1229_v30 = vld [vmem:[%s1967_s3] sm:$0xff] }
  0x1d   : > { %v658_v31 = vld [vmem:[%s1563_s29 + $0x20] sm:$0xff]  ;;  %v661_v32 = vld [vmem:[%s1563_s29 + $0x38] sm:$0xff]  ;;  %v659_v34 = vld [vmem:[%s1563_s29 + $0x28] sm:$0xff] }
  0x1e   : > { %607 = vmatpush.bf16.msra.mxu1 %v1234_v16  ;;  %1248 = vmatpush.bf16.msra.mxu3 %v1234_v16  ;;  %v666_v33 = vld [vmem:[%s1563_s29 + $0x60] sm:$0xff]  ;;  %v664_v35 = vld [vmem:[%s1563_s29 + $0x50] sm:$0xff]  ;;  %v669_v36 = vld [vmem:[%s1563_s29 + $0x78] sm:$0xff] }
  0x1f   : > { %685 = vperm.xlu2 %1298, %v658_v31   ;;  %v1611_v37 = vld [vmem:[%s1966_s2] ss:$0 sm:$0xff]  ;;  %v667_v41 = vld [vmem:[%s1563_s29 + $0x68] sm:$0xff]  ;;  %v665_v46 = vld [vmem:[%s1563_s29 + $0x58] sm:$0xff] }
  0x20   : > { %451 = vmatpush.bf16.msra.mxu0 %v1225_v3  ;;  %1241 = vmatpush.bf16.msra.mxu2 %v1225_v3  ;;  %v662_v40 = vld [vmem:[%s1563_s29 + $0x40] sm:$0xff]  ;;  %v668_v56 = vld [vmem:[%s1563_s29 + $0x70] sm:$0xff]  ;;  %s1381_s29 = scalar_lea.hbm %s1380_s22, 128 }
  0x21   : > { %676 = vperm.xlu0 %1296, %v655_v17   ;;  %p1382_p11 = scmp.ne.s32.totalorder %s1380_s22, %s1381_s29  ;;  %p1387_p1 = scmp.lt.s32.totalorder %s1385_s19, %s1381_s29 }
  0x22   : > { %608 = vmatpush.bf16.msra.mxu1 %v1233_v18  ;;  %1249 = vmatpush.bf16.msra.mxu3 %v1233_v18 }
  0x23   : > { %682 = vperm.xlu1 %1297, %v657_v28   ;;  %p1383_p12 = pnand %p1382_p11, %p1510_p5  ;;  %p1388_p2 = por %p1387_p1, %p1386_p0 }
  0x24   : > { %452 = vmatpush.bf16.msra.mxu0 %v1224_v4  ;;  %1242 = vmatpush.bf16.msra.mxu2 %v1224_v4 }
  0x25   : > { %p1384_p13 = pneg %p1383_p12 }
  0x26   : > { %609 = vmatpush.bf16.msra.mxu1 %v1232_v23  ;;  %1250 = vmatpush.bf16.msra.mxu3 %v1232_v23 }
  0x27   : > { %688 = vperm.xlu2 %1298, %v659_v34   ;;  %v670_v34 = vlaneseq  ;;  %p1389_p3 = pnand %p1388_p2, %p1384_p13 }
  0x28   : > { %453 = vmatpush.bf16.msra.mxu0 %v1223_v5  ;;  %1243 = vmatpush.bf16.msra.mxu2 %v1223_v5 }
  0x29   : > { %691 = vperm.xlu0 %1296, %v660_v25  }
  0x2a   : > { %610 = vmatpush.bf16.msra.mxu1 %v1231_v26  ;;  %1251 = vmatpush.bf16.msra.mxu3 %v1231_v26 }
  0x2b   : > { %694 = vperm.xlu1 %1297, %v661_v32  }
  0x2c   : > { %454 = vmatpush.bf16.msra.mxu0 %v1222_v6  ;;  %1244 = vmatpush.bf16.msra.mxu2 %v1222_v6 }
  0x2e   : > { %611 = vmatpush.bf16.msra.mxu1 %v1230_v27  ;;  %1252 = vmatpush.bf16.msra.mxu3 %v1230_v27 }
  0x2f   : > { %697 = vperm.xlu2 %1298, %v662_v40  }
  0x30   : > { %455 = vmatpush.bf16.msra.mxu0 %v1221_v7  ;;  %1245 = vmatpush.bf16.msra.mxu2 %v1221_v7 }
  0x31   : > { %700 = vperm.xlu0 %1296, %v663_v29  }
  0x32   : > { %612 = vmatpush.bf16.msra.mxu1 %v1229_v30  ;;  %1253 = vmatpush.bf16.msra.mxu3 %v1229_v30 }
  0x33   : > { %456 = vmatmul.bf16.vlgmr.msra.gmra.mxu0 %v1213_v8  ;;  %476 = vmatmul.bf16.vlgmr.msra.gmra.mxu2 %v1217_v9 }
  0x34   : > { %703 = vperm.xlu1 %1297, %v664_v35  }
  0x37   : > { %706 = vperm.xlu2 %1298, %v665_v46  }
  0x39   : > { %709 = vperm.xlu0 %1296, %v666_v33  }
  0x3c   : > { %712 = vperm.xlu1 %1297, %v667_v41  }
  0x3f   : > { %715 = vperm.xlu2 %1298, %v668_v56  }
  0x41   : > { %718 = vperm.xlu0 %1296, %v669_v36   ;;  %v1651_v36 = vand.u32 127, %v670_v34 }
  0x43   : > { %461 = vmatmul.bf16.gmra.mxu0 %v1214_v10  ;;  %481 = vmatmul.bf16.gmra.mxu2 %v1218_v11 }
  0x53   : > { %466 = vmatmul.bf16.gmra.mxu0 %v1215_v19  ;;  %486 = vmatmul.bf16.gmra.mxu2 %v1219_v20 }
  0x63   : > { %471 = vmatmul.bf16.gmra.mxu0 %v1216_v21  ;;  %491 = vmatmul.bf16.gmra.mxu2 %v1220_v22 }
  0x8b   : > { %v674_v35 = vpop.permute.xlu0 %673 }
  0x8c   : > { %vm720_vm0 = vcmp.eq.s32.totalorder %v1651_v36, %v674_v35 }
  0x8d   : > { %v680_v40 = vpop.permute.xlu1 %679 }
  0x8e   : > { %vm722_vm2 = vcmp.eq.s32.totalorder %v1651_v36, %v680_v40 }
  0x95   : > { %v683_v46 = vpop.permute.xlu1 %682 }
  0x96   : > { %vm723_vm7 = vcmp.eq.s32.totalorder %v1651_v36, %v683_v46 }
  0xb0   : > { %v457_v38 = vpop.f32.mrf.mxu0 }
  0xb1   : > { %v458_v39 = vadd.f32 %v1611_v37, %v457_v38  ;;  %v686_v38 = vpop.permute.xlu2 %685 }
  0xb2   : > { %vm724_vm6 = vcmp.eq.s32.totalorder %v1651_v36, %v686_v38 }
  0xb3   : > { %497 = vst [vmem:[%s1616_s23] sm:$0xff] %v458_v39  ;;  %v513_v47 = vmax.f32 %v458_v39, 0.0  ;;  %v1656_v39 = vld [vmem:[%s1968_s4] ss:$0 sm:$0xff] }
  0xb6   : > { %v477_v42 = vpop.f32.mrf.mxu2 }
  0xb7   : > { %v478_v43 = vadd.f32 %v1611_v37, %v477_v42 }
  0xb8   : > { %v459_v44 = vpop.f32.mrf.mxu0 }
  0xb9   : > { %505 = vst [vmem:[%s1616_s23 + $0x40] sm:$0xff] %v478_v43  ;;  %v460_v45 = vadd.f32 %v1611_v37, %v459_v44  ;;  %v521_v53 = vmax.f32 %v478_v43, 0.0  ;;  %v677_v43 = vpop.permute.xlu0 %676  ;;  %v1664_v44 = vpop.permute.xlu2 %688 }
  0xba   : > { %vm721_vm1 = vcmp.eq.s32.totalorder %v1651_v36, %v677_v43  ;;  %vm725_vm10 = vcmp.eq.s32.totalorder %v1651_v36, %v1664_v44 }
  0xbb   : > { %498 = vst [vmem:[%s1616_s23 + $0x8] sm:$0xff] %v460_v45  ;;  %v514_v48 = vmax.f32 %v460_v45, 0.0 }
  0xbd   : > { %v529_v49 = vpack.c.bf16 %v514_v48, %v513_v47 }
  0xbe   : > { %v479_v50 = vpop.f32.mrf.mxu2 }
  0xbf   : > { %v480_v51 = vadd.f32 %v1611_v37, %v479_v50  ;;  %613 = vmatmul.bf16.vlgmr.msra.gmra.mxu1 %v529_v49 }
  0xc0   : > { %v462_v52 = vpop.f32.mrf.mxu0 }
  0xc1   : > { %506 = vst [vmem:[%s1616_s23 + $0x48] sm:$0xff] %v480_v51  ;;  %v522_v54 = vmax.f32 %v480_v51, 0.0  ;;  %v463_v55 = vadd.f32 %v1611_v37, %v462_v52  ;;  %v1675_v51 = vpop.permute.xlu0 %691 }
  0xc2   : > { %vm726_vm11 = vcmp.eq.s32.totalorder %v1651_v36, %v1675_v51 }
  0xc3   : > { %499 = vst [vmem:[%s1616_s23 + $0x10] sm:$0xff] %v463_v55  ;;  %v533_v57 = vpack.c.bf16 %v522_v54, %v521_v53  ;;  %v515_v61 = vmax.f32 %v463_v55, 0.0  ;;  %v698_v53 = vpop.permute.xlu2 %697  ;;  %v1683_v55 = vpop.permute.xlu1 %694 }
  0xc4   : > { %vm728_vm3 = vcmp.eq.s32.totalorder %v1651_v36, %v698_v53  ;;  %vm727_vm13 = vcmp.eq.s32.totalorder %v1651_v36, %v1683_v55 }
  0xc5   : > { %633 = vmatmul.bf16.vlgmr.msra.gmra.mxu3 %v533_v57 }
  0xc6   : > { %v482_v58 = vpop.f32.mrf.mxu2 }
  0xc7   : > { %v483_v59 = vadd.f32 %v1611_v37, %v482_v58 }
  0xc8   : > { %v464_v60 = vpop.f32.mrf.mxu0 }
  0xc9   : > { %507 = vst [vmem:[%s1616_s23 + $0x50] sm:$0xff] %v483_v59  ;;  %v465_v62 = vadd.f32 %v1611_v37, %v464_v60  ;;  %v523_v4 = vmax.f32 %v483_v59, 0.0 }
  0xcb   : > { %500 = vst [vmem:[%s1616_s23 + $0x18] sm:$0xff] %v465_v62  ;;  %v516_v63 = vmax.f32 %v465_v62, 0.0 }
  0xcd   : > { %v530_v0 = vpack.c.bf16 %v516_v63, %v515_v61  ;;  %v701_v61 = vpop.permute.xlu0 %700 }
  0xce   : > { %v484_v1 = vpop.f32.mrf.mxu2  ;;  %vm729_vm4 = vcmp.eq.s32.totalorder %v1651_v36, %v701_v61 }
  0xcf   : > { %v485_v2 = vadd.f32 %v1611_v37, %v484_v1  ;;  %618 = vmatmul.bf16.gmra.mxu1 %v530_v0  ;;  %v704_v0 = vpop.permute.xlu1 %703 }
  0xd0   : > { %v467_v3 = vpop.f32.mrf.mxu0  ;;  %vm730_vm5 = vcmp.eq.s32.totalorder %v1651_v36, %v704_v0 }
  0xd1   : > { %508 = vst [vmem:[%s1616_s23 + $0x58] sm:$0xff] %v485_v2  ;;  %v524_v5 = vmax.f32 %v485_v2, 0.0  ;;  %v468_v6 = vadd.f32 %v1611_v37, %v467_v3 }
  0xd3   : > { %501 = vst [vmem:[%s1616_s23 + $0x20] sm:$0xff] %v468_v6  ;;  %v534_v7 = vpack.c.bf16 %v524_v5, %v523_v4  ;;  %v517_v11 = vmax.f32 %v468_v6, 0.0 }
  0xd5   : > { %638 = vmatmul.bf16.gmra.mxu3 %v534_v7 }
  0xd6   : > { %v487_v8 = vpop.f32.mrf.mxu2 }
  0xd7   : > { %v488_v9 = vadd.f32 %v1611_v37, %v487_v8 }
  0xd8   : > { %v469_v10 = vpop.f32.mrf.mxu0 }
  0xd9   : > { %509 = vst [vmem:[%s1616_s23 + $0x60] sm:$0xff] %v488_v9  ;;  %v470_v12 = vadd.f32 %v1611_v37, %v469_v10  ;;  %v525_v16 = vmax.f32 %v488_v9, 0.0 }
  0xdb   : > { %502 = vst [vmem:[%s1616_s23 + $0x28] sm:$0xff] %v470_v12  ;;  %v518_v13 = vmax.f32 %v470_v12, 0.0 }
  0xdd   : > { %v531_v14 = vpack.c.bf16 %v518_v13, %v517_v11  ;;  %v707_v13 = vpop.permute.xlu2 %706 }
  0xde   : > { %v489_v15 = vpop.f32.mrf.mxu2  ;;  %vm731_vm8 = vcmp.eq.s32.totalorder %v1651_v36, %v707_v13 }
  0xdf   : > { %v490_v17 = vadd.f32 %v1611_v37, %v489_v15  ;;  %623 = vmatmul.bf16.gmra.mxu1 %v531_v14  ;;  %v710_v14 = vpop.permute.xlu0 %709 }
  0xe0   : > { %v472_v18 = vpop.f32.mrf.mxu0  ;;  %vm732_vm9 = vcmp.eq.s32.totalorder %v1651_v36, %v710_v14 }
  0xe1   : > { %510 = vst [vmem:[%s1616_s23 + $0x68] sm:$0xff] %v490_v17  ;;  %v526_v19 = vmax.f32 %v490_v17, 0.0  ;;  %v473_v20 = vadd.f32 %v1611_v37, %v472_v18 }
  0xe3   : > { %503 = vst [vmem:[%s1616_s23 + $0x30] sm:$0xff] %v473_v20  ;;  %v535_v21 = vpack.c.bf16 %v526_v19, %v525_v16  ;;  %v519_v25 = vmax.f32 %v473_v20, 0.0 }
  0xe5   : > { %643 = vmatmul.bf16.gmra.mxu3 %v535_v21  ;;  %v713_v21 = vpop.permute.xlu1 %712 }
  0xe6   : > { %v492_v22 = vpop.f32.mrf.mxu2  ;;  %vm733_vm12 = vcmp.eq.s32.totalorder %v1651_v36, %v713_v21 }
  0xe7   : > { %v493_v23 = vadd.f32 %v1611_v37, %v492_v22  ;;  %v1761_v35 = vpop.permute.xlu0 %718 }
  0xe8   : > { %v474_v24 = vpop.f32.mrf.mxu0  ;;  %vm735_vm15 = vcmp.eq.s32.totalorder %v1651_v36, %v1761_v35 }
  0xe9   : > { %511 = vst [vmem:[%s1616_s23 + $0x70] sm:$0xff] %v493_v23  ;;  %v475_v26 = vadd.f32 %v1611_v37, %v474_v24  ;;  %v527_v30 = vmax.f32 %v493_v23, 0.0 }
  0xeb   : > { %504 = vst [vmem:[%s1616_s23 + $0x38] sm:$0xff] %v475_v26  ;;  %v520_v27 = vmax.f32 %v475_v26, 0.0 }
  0xed   : > { %v532_v28 = vpack.c.bf16 %v520_v27, %v519_v25 }
  0xee   : > { %v494_v29 = vpop.f32.mrf.mxu2 }
  0xef   : > { %v495_v31 = vadd.f32 %v1611_v37, %v494_v29  ;;  %628 = vmatmul.bf16.gmra.mxu1 %v532_v28 }
  0xf1   : > { %512 = vst [vmem:[%s1616_s23 + $0x78] sm:$0xff] %v495_v31  ;;  %v528_v32 = vmax.f32 %v495_v31, 0.0  ;;  %v716_v31 = vpop.permute.xlu2 %715 }
  0xf2   : > { %vm734_vm14 = vcmp.eq.s32.totalorder %v1651_v36, %v716_v31 }
  0xf3   : > { %v536_v33 = vpack.c.bf16 %v528_v32, %v527_v30 }
  0xf5   : > { %648 = vmatmul.bf16.gmra.mxu3 %v536_v33 }
 0x13c   : > { %v614_v41 = vpop.f32.mrf.mxu1 }
 0x13d   : > { %v1660_v37 = vadd.f32 %v1656_v39, %v614_v41 }
 0x13f   : > { %784 = vmax.xlane.f32.xlu2 %v1660_v37  ;;  %v736_v42 = vsel %vm720_vm0, %v1660_v37, 0.0 }
 0x140   : > { %752 = vadd.xlane.f32.xlu1 %v736_v42 }
 0x144   : > { %v616_v45 = vpop.f32.mrf.mxu1 }
 0x145   : > { %v1667_v47 = vadd.f32 %v1656_v39, %v616_v45 }
 0x147   : > { %786 = vmax.xlane.f32.xlu0 %v1667_v47  ;;  %v737_v48 = vsel %vm721_vm1, %v1667_v47, 0.0 }
 0x148   : > { %v634_v49 = vpop.f32.mrf.mxu3  ;;  %754 = vadd.xlane.f32.xlu2 %v737_v48 }
 0x149   : > { %v1673_v50 = vadd.f32 %v1656_v39, %v634_v49 }
 0x14b   : > { %800 = vmax.xlane.f32.xlu1 %v1673_v50  ;;  %v744_v57 = vsel %vm728_vm3, %v1673_v50, 0.0 }
 0x14c   : > { %v619_v52 = vpop.f32.mrf.mxu1 }
 0x14d   : > { %v1679_v54 = vadd.f32 %v1656_v39, %v619_v52 }
 0x14f   : > { %v738_v56 = vsel %vm722_vm2, %v1679_v54, 0.0 }
 0x150   : > { %v636_v58 = vpop.f32.mrf.mxu3  ;;  %756 = vadd.xlane.f32.xlu0 %v738_v56  ;;  %768 = vadd.xlane.f32.xlu2 %v744_v57 }
 0x151   : > { %v1688_v59 = vadd.f32 %v1656_v39, %v636_v58 }
 0x153   : > { %788 = vmax.xlane.f32.xlu1 %v1679_v54  ;;  %v745_v62 = vsel %vm729_vm4, %v1688_v59, 0.0 }
 0x154   : > { %v621_v60 = vpop.f32.mrf.mxu1 }
 0x155   : > { %v1700_v4 = vadd.f32 %v1656_v39, %v621_v60 }
 0x157   : > { %v739_v9 = vsel %vm723_vm7, %v1700_v4, 0.0 }
 0x158   : > { %v639_v63 = vpop.f32.mrf.mxu3  ;;  %770 = vadd.xlane.f32.xlu0 %v745_v62  ;;  %802 = vmax.xlane.f32.xlu2 %v1688_v59 }
 0x159   : > { %v1695_v1 = vadd.f32 %v1656_v39, %v639_v63 }
 0x15b   : > { %v746_v2 = vsel %vm730_vm5, %v1695_v1, 0.0 }
 0x15c   : > { %v624_v3 = vpop.f32.mrf.mxu1  ;;  %772 = vadd.xlane.f32.xlu1 %v746_v2 }
 0x15d   : > { %v1703_v5 = vadd.f32 %v1656_v39, %v624_v3 }
 0x15f   : > { %v740_v7 = vsel %vm724_vm6, %v1703_v5, 0.0 }
 0x160   : > { %v641_v6 = vpop.f32.mrf.mxu3  ;;  %804 = vmax.xlane.f32.xlu0 %v1695_v1  ;;  %790 = vmax.xlane.f32.xlu2 %v1700_v4 }
 0x161   : > { %v1713_v11 = vadd.f32 %v1656_v39, %v641_v6 }
 0x163   : > { %v747_v16 = vsel %vm731_vm8, %v1713_v11, 0.0 }
 0x164   : > { %760 = vadd.xlane.f32.xlu1 %v740_v7  ;;  %v626_v8 = vpop.f32.mrf.mxu1 }
 0x165   : > { %v1724_v18 = vadd.f32 %v1656_v39, %v626_v8 }
 0x167   : > { %v741_v24 = vsel %vm725_vm10, %v1724_v18, 0.0 }
 0x168   : > { %v644_v10 = vpop.f32.mrf.mxu3  ;;  %792 = vmax.xlane.f32.xlu0 %v1703_v5  ;;  %758 = vadd.xlane.f32.xlu2 %v739_v9 }
 0x169   : > { %v1716_v12 = vadd.f32 %v1656_v39, %v644_v10 }
 0x16b   : > { %v748_v15 = vsel %vm732_vm9, %v1716_v12, 0.0 }
 0x16c   : > { %806 = vmax.xlane.f32.xlu1 %v1713_v11  ;;  %v629_v17 = vpop.f32.mrf.mxu1 }
 0x16d   : > { %v1727_v19 = vadd.f32 %v1656_v39, %v629_v17 }
 0x16f   : > { %v742_v23 = vsel %vm726_vm11, %v1727_v19, 0.0 }
 0x170   : > { %776 = vadd.xlane.f32.xlu0 %v748_v15  ;;  %774 = vadd.xlane.f32.xlu2 %v747_v16  ;;  %v646_v20 = vpop.f32.mrf.mxu3 }
 0x171   : > { %v1735_v22 = vadd.f32 %v1656_v39, %v646_v20 }
 0x173   : > { %v749_v26 = vsel %vm733_vm12, %v1735_v22, 0.0 }
 0x174   : > { %794 = vmax.xlane.f32.xlu1 %v1724_v18  ;;  %v631_v25 = vpop.f32.mrf.mxu1 }
 0x175   : > { %v1742_v27 = vadd.f32 %v1656_v39, %v631_v25 }
 0x177   : > { %v743_v29 = vsel %vm727_vm13, %v1742_v27, 0.0 }
 0x178   : > { %764 = vadd.xlane.f32.xlu0 %v742_v23  ;;  %762 = vadd.xlane.f32.xlu2 %v741_v24  ;;  %v649_v28 = vpop.f32.mrf.mxu3 }
 0x179   : > { %v1752_v30 = vadd.f32 %v1656_v39, %v649_v28 }
 0x17b   : > { %v750_v34 = vsel %vm734_vm14, %v1752_v30, 0.0 }
 0x17c   : > { %778 = vadd.xlane.f32.xlu1 %v749_v26 }
 0x180   : > { %798 = vmax.xlane.f32.xlu0 %v1742_v27  ;;  %808 = vmax.xlane.f32.xlu2 %v1716_v12  ;;  %v651_v32 = vpop.f32.mrf.mxu3 }
 0x181   : > { %v1757_v33 = vadd.f32 %v1656_v39, %v651_v32 }
 0x184   : > { %766 = vadd.xlane.f32.xlu1 %v743_v29 }
 0x188   : > { %810 = vmax.xlane.f32.xlu0 %v1735_v22  ;;  %796 = vmax.xlane.f32.xlu2 %v1727_v19 }
 0x18c   : > { %812 = vmax.xlane.f32.xlu1 %v1752_v30 }
 0x190   : > { %780 = vadd.xlane.f32.xlu0 %v750_v34  ;;  %814 = vmax.xlane.f32.xlu2 %v1757_v33 }
 0x1b2   : > { %v1763_v38 = vpop.xlane.xlu2 %784 }
 0x1b3   : > { %v816_v40 = vsub.f32 %v1660_v37, %v1763_v38  ;;  %v1767_v42 = vpop.xlane.xlu1 %752 }
 0x1b5   : > { %v832_v41 = vmul.f32 1.442695, %v816_v40 }
 0x1b7   : > { %1301 = vpow2.f32 %v832_v41 }
 0x1ba   : > { %v1769_v43 = vpop.xlane.xlu0 %786 }
 0x1bb   : > { %v817_v39 = vsub.f32 %v1667_v47, %v1769_v43  ;;  %v1773_v44 = vpop.xlane.xlu2 %754 }
 0x1bd   : > { %v1302_v45 = vpop.eup %1301  ;;  %v834_v46 = vmul.f32 1.442695, %v817_v39 }
 0x1be   : > { %864 = vadd.xlane.f32.xlu1 %v1302_v45  ;;  %v1775_v48 = vpop.xlane.xlu1 %800 }
 0x1bf   : > { %1303 = vpow2.f32 %v834_v46  ;;  %v824_v37 = vsub.f32 %v1673_v50, %v1775_v48 }
 0x1c1   : > { %v848_v49 = vmul.f32 1.442695, %v824_v37 }
 0x1c3   : > { %1305 = vpow2.f32 %v848_v49  ;;  %v1779_v51 = vpop.xlane.xlu0 %756  ;;  %v1781_v52 = vpop.xlane.xlu2 %768 }
 0x1c5   : > { %v1304_v53 = vpop.eup %1303 }
 0x1c6   : > { %866 = vadd.xlane.f32.xlu2 %v1304_v53  ;;  %v1783_v47 = vpop.xlane.xlu1 %788 }
 0x1c7   : > { %v818_v55 = vsub.f32 %v1679_v54, %v1783_v47 }
 0x1c9   : > { %v1306_v56 = vpop.eup %1305  ;;  %v836_v57 = vmul.f32 1.442695, %v818_v55 }
 0x1ca   : > { %880 = vadd.xlane.f32.xlu0 %v1306_v56 }
 0x1cb   : > { %1307 = vpow2.f32 %v836_v57  ;;  %v1787_v58 = vpop.xlane.xlu0 %770  ;;  %v1789_v50 = vpop.xlane.xlu2 %802 }
 0x1cc   : > { %v825_v60 = vsub.f32 %v1688_v59, %v1789_v50 }
 0x1ce   : > { %v850_v61 = vmul.f32 1.442695, %v825_v60 }
 0x1cf   : > { %v1793_v62 = vpop.xlane.xlu1 %772 }
 0x1d0   : > { %1309 = vpow2.f32 %v850_v61 }
 0x1d1   : > { %v1308_v63 = vpop.eup %1307 }
 0x1d2   : > { %868 = vadd.xlane.f32.xlu0 %v1308_v63 }
 0x1d3   : > { %v1795_v0 = vpop.xlane.xlu0 %804  ;;  %v1797_v54 = vpop.xlane.xlu2 %790 }
 0x1d4   : > { %v826_v2 = vsub.f32 %v1695_v1, %v1795_v0  ;;  %v819_v3 = vsub.f32 %v1700_v4, %v1797_v54 }
 0x1d6   : > { %v1310_v6 = vpop.eup %1309  ;;  %v852_v7 = vmul.f32 1.442695, %v826_v2  ;;  %v838_v8 = vmul.f32 1.442695, %v819_v3 }
 0x1d7   : > { %882 = vadd.xlane.f32.xlu1 %v1310_v6  ;;  %v1803_v59 = vpop.xlane.xlu1 %760 }
 0x1d8   : > { %1311 = vpow2.f32 %v852_v7  ;;  %v751_v7 = vsel %vm735_vm15, %v1757_v33, 0.0 }
 0x1d9   : > { %1313 = vpow2.f32 %v838_v8 }
 0x1db   : > { %v1805_v9 = vpop.xlane.xlu0 %792  ;;  %v1807_v10 = vpop.xlane.xlu2 %758 }
 0x1dc   : > { %v820_v13 = vsub.f32 %v1703_v5, %v1805_v9 }
 0x1de   : > { %v1312_v14 = vpop.eup %1311  ;;  %v840_v1 = vmul.f32 1.442695, %v820_v13 }
 0x1df   : > { %v1314_v15 = vpop.eup %1313  ;;  %884 = vadd.xlane.f32.xlu2 %v1312_v14  ;;  %v1811_v4 = vpop.xlane.xlu1 %806 }
 0x1e0   : > { %1315 = vpow2.f32 %v840_v1  ;;  %870 = vadd.xlane.f32.xlu1 %v1314_v15  ;;  %v827_v16 = vsub.f32 %v1713_v11, %v1811_v4 }
 0x1e2   : > { %v854_v17 = vmul.f32 1.442695, %v827_v16 }
 0x1e3   : > { %v1815_v20 = vpop.xlane.xlu0 %776  ;;  %v1817_v21 = vpop.xlane.xlu2 %774 }
 0x1e4   : > { %1317 = vpow2.f32 %v854_v17 }
 0x1e6   : > { %v1316_v23 = vpop.eup %1315 }
 0x1e7   : > { %872 = vadd.xlane.f32.xlu2 %v1316_v23  ;;  %v1819_v5 = vpop.xlane.xlu1 %794 }
 0x1e8   : > { %v821_v24 = vsub.f32 %v1724_v18, %v1819_v5 }
 0x1ea   : > { %v1318_v25 = vpop.eup %1317  ;;  %v842_v26 = vmul.f32 1.442695, %v821_v24 }
 0x1eb   : > { %v1823_v28 = vpop.xlane.xlu0 %764  ;;  %v1825_v29 = vpop.xlane.xlu2 %762  ;;  %886 = vadd.xlane.f32.xlu0 %v1318_v25 }
 0x1ec   : > { %1319 = vpow2.f32 %v842_v26 }
 0x1ef   : > { %v1827_v11 = vpop.xlane.xlu1 %778 }
 0x1f2   : > { %v1320_v31 = vpop.eup %1319 }
 0x1f3   : > { %v1829_v32 = vpop.xlane.xlu0 %798  ;;  %v1831_v34 = vpop.xlane.xlu2 %808  ;;  %874 = vadd.xlane.f32.xlu0 %v1320_v31 }
 0x1f4   : > { %v823_v40 = vsub.f32 %v1742_v27, %v1829_v32  ;;  %v828_v18 = vsub.f32 %v1716_v12, %v1831_v34 }
 0x1f6   : > { %v846_v41 = vmul.f32 1.442695, %v823_v40  ;;  %v856_v39 = vmul.f32 1.442695, %v828_v18 }
 0x1f7   : > { %v1837_v45 = vpop.xlane.xlu1 %766 }
 0x1f8   : > { %1321 = vpow2.f32 %v846_v41 }
 0x1f9   : > { %1323 = vpow2.f32 %v856_v39 }
 0x1fb   : > { %v1839_v46 = vpop.xlane.xlu0 %810  ;;  %v1841_v37 = vpop.xlane.xlu2 %796 }
 0x1fc   : > { %v829_v49 = vsub.f32 %v1735_v22, %v1839_v46  ;;  %v822_v53 = vsub.f32 %v1727_v19, %v1841_v37 }
 0x1fe   : > { %v1322_v27 = vpop.eup %1321  ;;  %v858_v55 = vmul.f32 1.442695, %v829_v49  ;;  %v844_v56 = vmul.f32 1.442695, %v822_v53 }
 0x1ff   : > { %v1324_v12 = vpop.eup %1323  ;;  %878 = vadd.xlane.f32.xlu2 %v1322_v27  ;;  %v1847_v57 = vpop.xlane.xlu1 %812 }
 0x200   : > { %1325 = vpow2.f32 %v858_v55  ;;  %888 = vadd.xlane.f32.xlu1 %v1324_v12  ;;  %v830_v60 = vsub.f32 %v1752_v30, %v1847_v57 }
 0x201   : > { %1327 = vpow2.f32 %v844_v56 }
 0x202   : > { %v860_v61 = vmul.f32 1.442695, %v830_v60 }
 0x203   : > { %v1851_v63 = vpop.xlane.xlu2 %814 }
 0x204   : > { %1329 = vpow2.f32 %v860_v61  ;;  %v831_v19 = vsub.f32 %v1757_v33, %v1851_v63 }
 0x206   : > { %v1326_v22 = vpop.eup %1325  ;;  %v862_v2 = vmul.f32 1.442695, %v831_v19 }
 0x207   : > { %v1328_v3 = vpop.eup %1327  ;;  %890 = vadd.xlane.f32.xlu2 %v1326_v22 }
 0x208   : > { %1331 = vpow2.f32 %v862_v2  ;;  %876 = vadd.xlane.f32.xlu1 %v1328_v3 }
 0x20a   : > { %v1330_v6 = vpop.eup %1329 }
 0x20b   : > { %892 = vadd.xlane.f32.xlu0 %v1330_v6 }
 0x20e   : > { %v1332_v30 = vpop.eup %1331 }
 0x20f   : > { %782 = vadd.xlane.f32.xlu2 %v751_v7 }
 0x210   : > { %894 = vadd.xlane.f32.xlu1 %v1332_v30 }
 0x211   : > { %1392 = shalt.err (!%p1389_p3)
}
 0x212   : > { %s1430_s16 = smov 128   ;;  %s1431_s23 = smov 8   ;;  %v1875_v33 = vpop.xlane.xlu0 %780  ;;  %vm960_vm0 = vcmask 7168  }
 0x213   : > { %1254 = dma.vmem_to_hbm [thread:$0]  (%p1510_p5), %s996_s15, 2048, %s998_s17, %s978_s18, %s1430_s16, %s1430_s16, %s1431_s23  }
 0x214   : > { %s1883_s29 = scalar_lea.vmem %s1971_s7, %s1109_s20 }
 0x231   : > { %v865_v36 = vpop.xlane.xlu1 %864 }
 0x232   : > { %1333 = vlog2.f32 %v865_v36 }
 0x238   : > { %v1334_v35 = vpop.eup %1333 }
 0x239   : > { %v897_v8 = vmul.f32 0.6931472, %v1334_v35  ;;  %v867_v13 = vpop.xlane.xlu2 %866 }
 0x23a   : > { %1335 = vlog2.f32 %v867_v13 }
 0x23b   : > { %v928_v14 = vadd.f32 %v897_v8, %v1763_v38 }
 0x23d   : > { %v944_v1 = vsub.f32 %v1767_v42, %v928_v14  ;;  %v881_v15 = vpop.xlane.xlu0 %880 }
 0x23e   : > { %1337 = vlog2.f32 %v881_v15 }
 0x23f   : > { %961 = vst.msk [vmem:[%s1883_s29] sm:$0xff] %vm960_vm0, %v944_v1 }
 0x240   : > { %v1336_v16 = vpop.eup %1335 }
 0x241   : > { %v899_v17 = vmul.f32 0.6931472, %v1336_v16 }
 0x243   : > { %v929_v38 = vadd.f32 %v899_v17, %v1769_v43 }
 0x244   : > { %v1338_v23 = vpop.eup %1337 }
 0x245   : > { %v945_v24 = vsub.f32 %v1773_v44, %v929_v38  ;;  %v913_v25 = vmul.f32 0.6931472, %v1338_v23  ;;  %v869_v26 = vpop.xlane.xlu0 %868 }
 0x246   : > { %1339 = vlog2.f32 %v869_v26 }
 0x247   : > { %962 = vst.msk [vmem:[%s1883_s29 + $0x8] sm:$0xff] %vm960_vm0, %v945_v24  ;;  %v936_v42 = vadd.f32 %v913_v25, %v1775_v48 }
 0x249   : > { %v952_v31 = vsub.f32 %v1781_v52, %v936_v42 }
 0x24a   : > { %v883_v40 = vpop.xlane.xlu1 %882 }
 0x24b   : > { %969 = vst.msk [vmem:[%s1883_s29 + $0x40] sm:$0xff] %vm960_vm0, %v952_v31  ;;  %1341 = vlog2.f32 %v883_v40 }
 0x24c   : > { %v1340_v18 = vpop.eup %1339 }
 0x24d   : > { %v901_v43 = vmul.f32 0.6931472, %v1340_v18 }
 0x24f   : > { %v930_v41 = vadd.f32 %v901_v43, %v1783_v47 }
 0x251   : > { %v1342_v44 = vpop.eup %1341  ;;  %v946_v39 = vsub.f32 %v1779_v51, %v930_v41 }
 0x252   : > { %v915_v49 = vmul.f32 0.6931472, %v1342_v44  ;;  %v885_v53 = vpop.xlane.xlu2 %884 }
 0x253   : > { %963 = vst.msk [vmem:[%s1883_s29 + $0x10] sm:$0xff] %vm960_vm0, %v946_v39  ;;  %1343 = vlog2.f32 %v885_v53  ;;  %v871_v48 = vpop.xlane.xlu1 %870 }
 0x254   : > { %v937_v52 = vadd.f32 %v915_v49, %v1789_v50  ;;  %1345 = vlog2.f32 %v871_v48 }
 0x256   : > { %v953_v27 = vsub.f32 %v1787_v58, %v937_v52 }
 0x258   : > { %970 = vst.msk [vmem:[%s1883_s29 + $0x48] sm:$0xff] %vm960_vm0, %v953_v27 }
 0x259   : > { %v1344_v55 = vpop.eup %1343 }
 0x25a   : > { %v1346_v47 = vpop.eup %1345  ;;  %v917_v56 = vmul.f32 0.6931472, %v1344_v55  ;;  %v873_v12 = vpop.xlane.xlu2 %872 }
 0x25b   : > { %v903_v51 = vmul.f32 0.6931472, %v1346_v47  ;;  %1347 = vlog2.f32 %v873_v12 }
 0x25c   : > { %v938_v60 = vadd.f32 %v917_v56, %v1795_v0 }
 0x25d   : > { %v931_v61 = vadd.f32 %v903_v51, %v1797_v54 }
 0x25e   : > { %v954_v50 = vsub.f32 %v1793_v62, %v938_v60  ;;  %v887_v19 = vpop.xlane.xlu0 %886 }
 0x25f   : > { %v947_v58 = vsub.f32 %v1807_v10, %v931_v61  ;;  %1349 = vlog2.f32 %v887_v19 }
 0x260   : > { %971 = vst.msk [vmem:[%s1883_s29 + $0x50] sm:$0xff] %vm960_vm0, %v954_v50 }
 0x261   : > { %v1348_v22 = vpop.eup %1347  ;;  %964 = vst.msk [vmem:[%s1883_s29 + $0x18] sm:$0xff] %vm960_vm0, %v947_v58 }
 0x262   : > { %v905_v2 = vmul.f32 0.6931472, %v1348_v22 }
 0x264   : > { %v932_v3 = vadd.f32 %v905_v2, %v1805_v9 }
 0x265   : > { %v1350_v6 = vpop.eup %1349 }
 0x266   : > { %v948_v0 = vsub.f32 %v1803_v59, %v932_v3  ;;  %v919_v54 = vmul.f32 0.6931472, %v1350_v6  ;;  %v875_v30 = vpop.xlane.xlu0 %874 }
 0x267   : > { %1351 = vlog2.f32 %v875_v30 }
 0x268   : > { %965 = vst.msk [vmem:[%s1883_s29 + $0x20] sm:$0xff] %vm960_vm0, %v948_v0  ;;  %v939_v62 = vadd.f32 %v919_v54, %v1811_v4 }
 0x26a   : > { %v955_v10 = vsub.f32 %v1817_v21, %v939_v62 }
 0x26c   : > { %972 = vst.msk [vmem:[%s1883_s29 + $0x58] sm:$0xff] %vm960_vm0, %v955_v10 }
 0x26d   : > { %v1352_v7 = vpop.eup %1351 }
 0x26e   : > { %v907_v36 = vmul.f32 0.6931472, %v1352_v7 }
 0x270   : > { %v933_v35 = vadd.f32 %v907_v36, %v1819_v5 }
 0x272   : > { %v949_v9 = vsub.f32 %v1825_v29, %v933_v35  ;;  %v879_v8 = vpop.xlane.xlu2 %878 }
 0x273   : > { %1353 = vlog2.f32 %v879_v8  ;;  %v889_v59 = vpop.xlane.xlu1 %888 }
 0x274   : > { %966 = vst.msk [vmem:[%s1883_s29 + $0x28] sm:$0xff] %vm960_vm0, %v949_v9  ;;  %1355 = vlog2.f32 %v889_v59 }
 0x279   : > { %v1354_v13 = vpop.eup %1353 }
 0x27a   : > { %v1356_v4 = vpop.eup %1355  ;;  %v911_v14 = vmul.f32 0.6931472, %v1354_v13  ;;  %v891_v21 = vpop.xlane.xlu2 %890 }
 0x27b   : > { %v921_v1 = vmul.f32 0.6931472, %v1356_v4  ;;  %1357 = vlog2.f32 %v891_v21  ;;  %v877_v15 = vpop.xlane.xlu1 %876 }
 0x27c   : > { %v935_v16 = vadd.f32 %v911_v14, %v1829_v32  ;;  %1359 = vlog2.f32 %v877_v15 }
 0x27d   : > { %v940_v5 = vadd.f32 %v921_v1, %v1831_v34 }
 0x27e   : > { %v951_v29 = vsub.f32 %v1837_v45, %v935_v16  ;;  %v893_v17 = vpop.xlane.xlu0 %892 }
 0x27f   : > { %v956_v38 = vsub.f32 %v1815_v20, %v940_v5  ;;  %1361 = vlog2.f32 %v893_v17 }
 0x280   : > { %968 = vst.msk [vmem:[%s1883_s29 + $0x38] sm:$0xff] %vm960_vm0, %v951_v29 }
 0x281   : > { %v1358_v23 = vpop.eup %1357  ;;  %973 = vst.msk [vmem:[%s1883_s29 + $0x60] sm:$0xff] %vm960_vm0, %v956_v38 }
 0x282   : > { %v1360_v24 = vpop.eup %1359  ;;  %v923_v25 = vmul.f32 0.6931472, %v1358_v23 }
 0x283   : > { %v909_v32 = vmul.f32 0.6931472, %v1360_v24  ;;  %v895_v26 = vpop.xlane.xlu1 %894 }
 0x284   : > { %v941_v34 = vadd.f32 %v923_v25, %v1839_v46  ;;  %1363 = vlog2.f32 %v895_v26 }
 0x285   : > { %v1362_v45 = vpop.eup %1361  ;;  %v934_v20 = vadd.f32 %v909_v32, %v1841_v37  ;;  %v783_v37 = vpop.xlane.xlu2 %782 }
 0x286   : > { %v957_v42 = vsub.f32 %v1827_v11, %v941_v34  ;;  %v925_v31 = vmul.f32 0.6931472, %v1362_v45 }
 0x287   : > { %v950_v40 = vsub.f32 %v1823_v28, %v934_v20 }
 0x288   : > { %974 = vst.msk [vmem:[%s1883_s29 + $0x68] sm:$0xff] %vm960_vm0, %v957_v42  ;;  %v942_v18 = vadd.f32 %v925_v31, %v1847_v57 }
 0x289   : > { %967 = vst.msk [vmem:[%s1883_s29 + $0x30] sm:$0xff] %vm960_vm0, %v950_v40 }
 0x28a   : > { %v1364_v43 = vpop.eup %1363  ;;  %v958_v41 = vsub.f32 %v1875_v33, %v942_v18 }
 0x28b   : > { %v927_v46 = vmul.f32 0.6931472, %v1364_v43 }
 0x28c   : > { %975 = vst.msk [vmem:[%s1883_s29 + $0x70] sm:$0xff] %vm960_vm0, %v958_v41 }
 0x28d   : > { %v943_v44 = vadd.f32 %v927_v46, %v1851_v63 }
 0x28f   : > { %v959_v39 = vsub.f32 %v783_v37, %v943_v44 }
 0x291   : > { %976 = vst.msk [vmem:[%s1883_s29 + $0x78] sm:$0xff] %vm960_vm0, %v959_v39 }
 0x292 PF: > { %p1260_p4 = scmp.ge.s32.totalorder %s1427_s27, 2  ;;  %s1016_s11 = sand.u32 1, %s1415_s24  }
 0x293   : > { %s1017_s21 = scalar_lea.sflag [#allocation3], %s1016_s11 }
 0x294   : > { %p1257_p5 = pnand %p1260_p4, %p1514_p6 }
 0x296   : > { %p1258_p7 = pneg %p1257_p5 }
 0x298   : > { %1410 = dma.done.wait (%p1258_p7), %s1017_s21, 2048  }
 0x299   : > { %1412 = vsyncadd (%p1258_p7), %s1017_s21, 4294965248  ;;  %p18_p8 = scmp.ge.s32.totalorder %s1497_s30, 6   ;;  %s1974_s24 = smov %s1419_s25 }
 0x29a   : > { %s1975_s25 = smov %s1423_s26  ;;  %s1976_s26 = smov %s1508_s10 }
 0x29b   : > { %s1977_s27 = smov %s1497_s30  ;;  %20 = sbr.rel (!%p18_p8) target bundleno = 3 (0x3), region = 94 }
 0x2a0   :  { %1031 = vsyncpa [#allocation3], 1 }
 0x2a1   :  { %1033 = vsyncpa [#allocation3 + $0x1], 1 }

</bundles_post_ra>
